<compile_context>
chip_gen: v7x
topology: tpu7x:2x2x1
jax: 0.10.0
libtpu: 0.0.40
codegen_flags: <defaults>
</compile_context>

<pallas_src>
import math
import numpy as np
import jax
import jax.numpy as jnp
from jax.experimental import pallas as pl
from jax.experimental.pallas import tpu as pltpu


def _haar_width_matrix(W):
    """Fused low|high Haar analysis matrix along width.

    Returns B of shape (W, W) such that for an (unscaled) height-transformed
    row r:  (r @ B)[:W//2] are the low-pass (LL/HL) coefficients and
    (r @ B)[W//2:] are the high-pass (LH/HH) coefficients.  The 1/sqrt(2)
    height scale is folded in, so the overall scale per entry is 1/2.
    """
    Wo = W // 2
    B = np.zeros((W, W), dtype=np.float32)
    for j in range(Wo):
        B[2 * j, j] = 0.5
        B[2 * j + 1, j] = 0.5
        B[2 * j, Wo + j] = 0.5
        B[2 * j + 1, Wo + j] = -0.5
    return B


def _dwt_kernel(x_ref, b_ref, lo_ref, hi_ref):
    # x_ref: (Bc*H, W) rows of Bc whole planes; b_ref: (W, W) fused Haar matrix.
    half = x_ref.shape[0] // 2
    # Strided sublane reads: even / odd rows of the block (VPU path, no
    # sparse height matmul).
    xe = x_ref[pl.ds(0, half, 2), :]          # x[2i]
    xo = x_ref[pl.ds(1, half, 2), :]          # x[2i+1]
    b = b_ref[...]
    low = xe + xo                              # unscaled height low-pass
    high = xe - xo                             # unscaled height high-pass
    # One big lane-dense matmul per sub-band pair: (Bc*H/2, W) @ (W, W).
    lo_ref[...] = jnp.dot(low, b,
                          preferred_element_type=jnp.float32).astype(lo_ref.dtype)
    hi_ref[...] = jnp.dot(high, b,
                          preferred_element_type=jnp.float32).astype(hi_ref.dtype)


def _choose_block_planes(NC, H, W, itemsize, budget_bytes=20 * 1024 * 1024):
    """Pick how many (H, W) planes to process per grid step."""
    Ho = H // 2
    lanes = ((W + 127) // 128) * 128           # VMEM lane padding
    # input rows H + two output slabs of Ho rows each, double-buffered (x2).
    per_plane = (H + 2 * Ho) * lanes * itemsize * 2
    cap = max(1, budget_bytes // per_plane)

    def legal(bc):
        # (8,128) rule: leading block dim multiple of 8, or full extent.
        ok_in = (bc * H) % 8 == 0 or bc == NC
        ok_out = (bc * Ho) % 8 == 0 or bc == NC
        return ok_in and ok_out

    divisors = [d for d in range(1, NC + 1) if NC % d == 0]
    cands = [d for d in divisors if d <= cap and legal(d)]
    if not cands:
        return NC                               # single full block always legal
    multi = [d for d in cands if NC // d >= 2]  # keep >=2 grid steps (megacore)
    return max(multi) if multi else max(cands)


def my_downsampling_dwt(x):
    """Forward of My_DownSampling_DWT: returns (LL, LH, HL, HH, input)."""
    N, C, H, W = x.shape
    assert H % 2 == 0 and W % 2 == 0, "Haar DWT needs even spatial dims"
    dtype = x.dtype
    NC = N * C
    Ho, Wo = H // 2, W // 2
    itemsize = jnp.dtype(dtype).itemsize

    # TODO(synk): on v5e with bf16 inputs, upcast xe/xo to f32 in-kernel
    # (v5e VPU has no bf16); v6e/v7x take bf16 directly.
    bmat = jnp.asarray(_haar_width_matrix(W), dtype)
    xf = x.reshape(NC * H, W)

    bc = _choose_block_planes(NC, H, W, itemsize)
    grid = NC // bc
    rows_in = bc * H
    rows_out = bc * Ho

    flops = 2 * 2 * (NC * Ho) * W * W + 2 * NC * Ho * W
    bytes_accessed = 2 * NC * H * W * itemsize + W * W * itemsize

    lo, hi = pl.pallas_call(
        _dwt_kernel,
        out_shape=(jax.ShapeDtypeStruct((NC * Ho, W), dtype),
                   jax.ShapeDtypeStruct((NC * Ho, W), dtype)),
        grid_spec=pltpu.PrefetchScalarGridSpec(
            num_scalar_prefetch=0,
            grid=(grid,),
            in_specs=[pl.BlockSpec((rows_in, W), lambda g: (g, 0)),
                      pl.BlockSpec((W, W), lambda g: (0, 0))],
            out_specs=[pl.BlockSpec((rows_out, W), lambda g: (g, 0)),
                       pl.BlockSpec((rows_out, W), lambda g: (g, 0))],
        ),
        compiler_params=pltpu.CompilerParams(
            dimension_semantics=("parallel",),
            vmem_limit_bytes=32 * 1024 * 1024),
        cost_estimate=pl.CostEstimate(
            flops=flops, transcendentals=0, bytes_accessed=bytes_accessed),
    )(xf, bmat)

    lo = lo.reshape(N, C, Ho, W)
    hi = hi.reshape(N, C, Ho, W)
    ll, lh = lo[..., :Wo], lo[..., Wo:]
    hl, hh = hi[..., :Wo], hi[..., Wo:]
    return ll, lh, hl, hh, x


def _reference(x):
    # Pure-JAX Haar DWT reference (matrix formulation of DWT_2D).
    x = x.astype(jnp.float32)
    e_r, o_r = x[:, :, 0::2, :], x[:, :, 1::2, :]
    low_r, high_r = (e_r + o_r) / jnp.sqrt(2.0), (e_r - o_r) / jnp.sqrt(2.0)

    def along_w(t):
        e, o = t[:, :, :, 0::2], t[:, :, :, 1::2]
        return (e + o) / jnp.sqrt(2.0), (e - o) / jnp.sqrt(2.0)

    ll, lh = along_w(low_r)
    hl, hh = along_w(high_r)
    return ll, lh, hl, hh


if __name__ == "__main__":
    key = jax.random.PRNGKey(0)
    N, C, H, W = 2, 4, 16, 16
    x = jax.random.normal(key, (N, C, H, W), dtype=jnp.float32)

    outs = my_downsampling_dwt(x)
    outs = jax.block_until_ready(outs)
    ll, lh, hl, hh, xin = outs

    # Sanity check against pure-JAX reference.
    rll, rlh, rhl, rhh = _reference(x)
    np.testing.assert_allclose(np.asarray(ll), np.asarray(rll), atol=1e-5)
    np.testing.assert_allclose(np.asarray(lh), np.asarray(rlh), atol=1e-5)
    np.testing.assert_allclose(np.asarray(hl), np.asarray(rhl), atol=1e-5)
    np.testing.assert_allclose(np.asarray(hh), np.asarray(rhh), atol=1e-5)
    np.testing.assert_allclose(np.asarray(xin), np.asarray(x), atol=0.0)

    print("KERNEL_OK")
</pallas_src>

<mosaic_0001>
module attributes {stable_mosaic.version = 11 : i64} {
  func.func @_dwt_kernel(%arg0: i32, %arg1: memref<64x16xf32, #tpu.memory_space<vmem>>, %arg2: memref<16x16xf32, #tpu.memory_space<vmem>>, %arg3: memref<32x16xf32, #tpu.memory_space<vmem>>, %arg4: memref<32x16xf32, #tpu.memory_space<vmem>>) attributes {dimension_semantics = [#tpu.dimension_semantics<parallel>], iteration_bounds = array<i64: 2>, scalar_prefetch = 0 : i64, scratch_operands = 0 : i64, tpu.core_type = #tpu.core_type<tc>, window_params = [{transform_indices = @transform_0, window_bounds = array<i64: 64, 16>}, {pipeline_mode = #tpu.pipeline_mode<synchronous>, transform_indices = @transform_1, window_bounds = array<i64: 16, 16>}, {transform_indices = @transform_2, window_bounds = array<i64: 32, 16>}, {transform_indices = @transform_3, window_bounds = array<i64: 32, 16>}]} {
    %c0 = arith.constant 0 : index
    %c0_0 = arith.constant 0 : index
    %0 = tpu.strided_load %arg1[%c0, %c0_0] {strides = array<i32: 2, 1>} : memref<64x16xf32, #tpu.memory_space<vmem>>, vector<32x16xf32>
    %c1 = arith.constant 1 : index
    %c0_1 = arith.constant 0 : index
    %1 = tpu.strided_load %arg1[%c1, %c0_1] {strides = array<i32: 2, 1>} : memref<64x16xf32, #tpu.memory_space<vmem>>, vector<32x16xf32>
    %c0_2 = arith.constant 0 : index
    %c0_3 = arith.constant 0 : index
    %2 = vector.load %arg2[%c0_2, %c0_3] : memref<16x16xf32, #tpu.memory_space<vmem>>, vector<16x16xf32>
    %3 = arith.addf %0, %1 : vector<32x16xf32>
    %4 = arith.subf %0, %1 : vector<32x16xf32>
    %cst = arith.constant dense<0.000000e+00> : vector<32x16xf32>
    %5 = tpu.matmul %3, %2, %cst {dimension_numbers = #tpu.dot_dimension_numbers<[1], [0], [0], [1], [0, 0, 1, 1], [], []>} : vector<32x16xf32>, vector<16x16xf32>, vector<32x16xf32> -> vector<32x16xf32>
    %c0_4 = arith.constant 0 : index
    %c0_5 = arith.constant 0 : index
    %6 = vector.load %arg3[%c0_4, %c0_5] : memref<32x16xf32, #tpu.memory_space<vmem>>, vector<32x16xf32>
    tpu.vector_store %arg3[%c0_4, %c0_5], %5 {strides = array<i32>} : memref<32x16xf32, #tpu.memory_space<vmem>>, vector<32x16xf32>,
    %cst_6 = arith.constant dense<0.000000e+00> : vector<32x16xf32>
    %7 = tpu.matmul %4, %2, %cst_6 {dimension_numbers = #tpu.dot_dimension_numbers<[1], [0], [0], [1], [0, 0, 1, 1], [], []>} : vector<32x16xf32>, vector<16x16xf32>, vector<32x16xf32> -> vector<32x16xf32>
    %c0_7 = arith.constant 0 : index
    %c0_8 = arith.constant 0 : index
    %8 = vector.load %arg4[%c0_7, %c0_8] : memref<32x16xf32, #tpu.memory_space<vmem>>, vector<32x16xf32>
    tpu.vector_store %arg4[%c0_7, %c0_8], %7 {strides = array<i32>} : memref<32x16xf32, #tpu.memory_space<vmem>>, vector<32x16xf32>,
    return
  }
  func.func @transform_0(%arg0: i32) -> (i32, i32) {
    %c0_i32 = arith.constant 0 : i32
    %c0_i32_0 = arith.constant 0 : i32
    return %arg0, %c0_i32 : i32, i32
  }
  func.func @transform_1(%arg0: i32) -> (i32, i32) {
    %c0_i32 = arith.constant 0 : i32
    %c0_i32_0 = arith.constant 0 : i32
    %c0_i32_1 = arith.constant 0 : i32
    return %c0_i32, %c0_i32_0 : i32, i32
  }
  func.func @transform_2(%arg0: i32) -> (i32, i32) {
    %c0_i32 = arith.constant 0 : i32
    %c0_i32_0 = arith.constant 0 : i32
    return %arg0, %c0_i32 : i32, i32
  }
  func.func @transform_3(%arg0: i32) -> (i32, i32) {
    %c0_i32 = arith.constant 0 : i32
    %c0_i32_0 = arith.constant 0 : i32
    return %arg0, %c0_i32 : i32, i32
  }
}

</mosaic_0001>

<bundles_post_ra>
// kernel: tpu_custom_call.1
= control target key start
LH: loop header
LB: loop body
LE: loop exit
PB: predicated region body
PF: predicated region fallthrough
CT: control target
= control target key end

     0   :  { %s610_s12 = smov 0   ;;  %s656_s0 = inlined_call_operand.vmem [shape: f32[128,16], index: 0, kind: input, shape index: {}]   ;;  %s657_s1 = inlined_call_operand.vmem [shape: f32[16,16], index: 1, kind: input, shape index: {}]   ;;  %s658_s2 = inlined_call_operand.vmem [shape: f32[64,16], index: 2, kind: output, shape index: {0}]   ;;  %s659_s3 = inlined_call_operand.vmem [shape: f32[64,16], index: 3, kind: output, shape index: {1}]  }
   0x1 LB: > { %s506_s13 = sadd.s32 4294967295, %s588_s12   ;;  %p510_p0 = scmp.ge.s32.totalorder %s588_s12, 1  ;;  %s588_s12 = sphi %s610_s12, %s14_s12  }
   0x2   : > { %p141_p1 = scmp.lt.s32.totalorder %s588_s12, 3 }
   0x4   : > { %p142_p2 = pnand %p510_p0, %p141_p1 }
   0x5   : > { %v203_v0 = vld [vmem:[%s657_s1] sm:$0xff] (!%p142_p2)  ;;  %v204_v1 = vld [vmem:[%s657_s1 + $0x8] sm:$0xff] (!%p142_p2)  ;;  %s511_s18 = sshll.u32 (!%p142_p2), %s506_s13, 3  ;;  %vm213_vm0 = vcmask (!%p142_p2), 130048   ;;  %s513_s23 = sshll.u32 (!%p142_p2), %s506_s13, 2 }
   0x6   : > { %145 = sbr.rel (%p142_p2) target bundleno = 238 (0xee), region = 28  ;;  %v566_v2 = vpack.c.bf16 (!%p142_p2), %v204_v1, %v203_v0  ;;  %p171_p3 = scmp.lt.s32.totalorder (!%p142_p2), %s511_s18, 15 }
   0x7   : > { %p177_p4 = scmp.lt.s32.totalorder (!%p142_p2), %s513_s23, 7 }
   0x8   : > { %567 = vmatprep.subr.bf16.mxu0 (!%p142_p2), %v566_v2  ;;  %571 = vmatprep.subr.bf16.mxu1 (!%p142_p2), %v566_v2 }
   0x9   : > { %569 = vmatpush3.bf16.msra.mxu0 (!%p142_p2), %v566_v2  ;;  %573 = vmatpush3.bf16.msra.mxu1 (!%p142_p2), %v566_v2 }
   0xd   : > { %s661_s18 = smov (!%p171_p3, %s511_s18), 15  ;;  %s663_s23 = smov (!%p177_p4, %s513_s23), 7 }
   0xe   : > { %s512_s19 = sshll.u32 %s661_s18, 3  ;;  %s514_s24 = sshll.u32 %s663_s23, 3 }
   0xf   : > { %s174_s22 = scalar_lea.vmem %s656_s0, %s512_s19  ;;  %s180_s27 = scalar_lea.vmem %s658_s2, %s514_s24 }
  0x10   : > { %v188_v3 = vld [vmem:[%s174_s22] ss:$2 sm:$0xff]  ;;  %v520_v4 = vld [vmem:[%s174_s22 + $0x1] ss:$2 sm:$0xff]  ;;  %v517_v5 = vld [vmem:[%s174_s22 + $0x10] ss:$2 sm:$0xff]  ;;  %s186_s30 = scalar_lea.vmem %s659_s3, %s514_s24 }
  0x11   : > { %v205_v6 = vadd.f32 %v520_v4, %v188_v3  ;;  %v209_v7 = vsub.f32 %v188_v3, %v520_v4  ;;  %v521_v8 = vld [vmem:[%s174_s22 + $0x11] ss:$2 sm:$0xff]  ;;  %v518_v9 = vld [vmem:[%s174_s22 + $0x20] ss:$2 sm:$0xff]  ;;  %v522_v10 = vld [vmem:[%s174_s22 + $0x21] ss:$2 sm:$0xff] }
  0x12   : > { %v206_v11 = vadd.f32 %v521_v8, %v517_v5  ;;  %v210_v12 = vsub.f32 %v517_v5, %v521_v8  ;;  %v207_v13 = vadd.f32 %v522_v10, %v518_v9  ;;  %v211_v14 = vsub.f32 %v518_v9, %v522_v10  ;;  %v519_v15 = vld [vmem:[%s174_s22 + $0x30] ss:$2 sm:$0xff]  ;;  %v523_v16 = vld [vmem:[%s174_s22 + $0x31] ss:$2 sm:$0xff] }
  0x13   : > { %550 = vmatprep.mubr.msk.f32.mxu0 %vm213_vm0, %v205_v6  ;;  %560 = vmatprep.mubr.msk.f32.mxu1 %vm213_vm0, %v209_v7  ;;  %v208_v17 = vadd.f32 %v523_v16, %v519_v15  ;;  %v212_v18 = vsub.f32 %v519_v15, %v523_v16 }
  0x14   : > { %551 = vmatmul.mubr.msk.f32.vlgmr.msra.gmra.mrb[0].mxu0 %vm213_vm0, %v206_v11  ;;  %561 = vmatmul.mubr.msk.f32.vlgmr.msra.gmra.mrb[0].mxu1 %vm213_vm0, %v210_v12 }
  0x15   : > { %553 = vmatprep.mubr.msk.f32.mxu0 %vm213_vm0, %v207_v13  ;;  %563 = vmatprep.mubr.msk.f32.mxu1 %vm213_vm0, %v211_v14 }
  0x18   : > { %554 = vmatmul.mubr.msk.f32.gmra.mrb[2].mxu0 %vm213_vm0, %v208_v17  ;;  %564 = vmatmul.mubr.msk.f32.gmra.mrb[2].mxu1 %vm213_vm0, %v212_v18 }
  0xe7   : > { %v552_v19 = vpop.f32.mrb[0].mxu0  ;;  %v562_v20 = vpop.f32.mrb[0].mxu1 }
  0xe8   : > { %v292_v21 = vpop.f32.mrb[1].mxu0  ;;  %v393_v22 = vpop.f32.mrb[1].mxu1  ;;  %312 = vst.msk [vmem:[%s180_s27 + $0x8] sm:$0xff] %vm213_vm0, %v552_v19  ;;  %413 = vst.msk [vmem:[%s186_s30 + $0x8] sm:$0xff] %vm213_vm0, %v562_v20 }
  0xe9   : > { %311 = vst.msk [vmem:[%s180_s27] sm:$0xff] %vm213_vm0, %v292_v21  ;;  %412 = vst.msk [vmem:[%s186_s30] sm:$0xff] %vm213_vm0, %v393_v22 }
  0xeb   : > { %v555_v23 = vpop.f32.mrb[2].mxu0  ;;  %v565_v24 = vpop.f32.mrb[2].mxu1 }
  0xec   : > { %v302_v25 = vpop.f32.mrb[3].mxu0  ;;  %v403_v26 = vpop.f32.mrb[3].mxu1  ;;  %314 = vst.msk [vmem:[%s180_s27 + $0x18] sm:$0xff] %vm213_vm0, %v555_v23  ;;  %415 = vst.msk [vmem:[%s186_s30 + $0x18] sm:$0xff] %vm213_vm0, %v565_v24 }
  0xed   : > { %313 = vst.msk [vmem:[%s180_s27 + $0x10] sm:$0xff] %vm213_vm0, %v302_v25  ;;  %414 = vst.msk [vmem:[%s186_s30 + $0x10] sm:$0xff] %vm213_vm0, %v403_v26 }
  0xee PF: > { %s14_s12 = sadd.s32 1, %s588_s12  }
  0xef   : > { %p11_p5 = scmp.ge.s32.totalorder %s14_s12, 4  }
  0xf1   :  { %13 = sbr.rel (!%p11_p5) target bundleno = 1 (0x1), region = 77 }

</bundles_post_ra>
